<compile_context>
chip_gen: v5e
topology: v5e:2x2
jax: 0.10.0
libtpu: 0.0.40
codegen_flags: <defaults>
</compile_context>

<pallas_src>
import functools

import jax
import jax.numpy as jnp
from jax.experimental import pallas as pl
from jax.experimental.pallas import tpu as pltpu


def _fedavg_kernel(x_ref, w_ref, b_ref, o_ref):
    # x_ref: (in_f, 8, TB//8) f32 VMEM   (sublane-dense, feature-major batch tile)
    # w_ref: (2, in_f)        f32 SMEM   (PyTorch nn.Linear weight, scalar reads)
    # b_ref: (2,)             f32 SMEM
    # o_ref: (2, 8, TB//8)    f32 VMEM   (sublane-dense log-probabilities)
    in_f = x_ref.shape[0]

    # Linear: 2 x in_f unrolled VPU FMAs; each SMEM scalar broadcasts across the slab.
    xk = x_ref[0]                                   # (8, TB//8) full-sublane slab
    acc0 = xk * w_ref[0, 0]
    acc1 = xk * w_ref[1, 0]
    for k in range(1, in_f):                        # static unroll, in_f == 10
        xk = x_ref[k]
        acc0 = acc0 + xk * w_ref[0, k]
        acc1 = acc1 + xk * w_ref[1, k]
    acc0 = acc0 + b_ref[0]
    acc1 = acc1 + b_ref[1]

    # ReLU
    y0 = jnp.maximum(acc0, 0.0)
    y1 = jnp.maximum(acc1, 0.0)

    # 2-class log_softmax with no cross-lane reduce (1 exp + 1 log1p on the EUP).
    m = jnp.maximum(y0, y1)
    lse = m + jnp.log1p(jnp.exp(-jnp.abs(y0 - y1)))

    # Full-slab, unmasked stores.
    o_ref[0] = (y0 - lse).astype(o_ref.dtype)
    o_ref[1] = (y1 - lse).astype(o_ref.dtype)


@functools.partial(jax.jit, static_argnames=("block_b",))
def fedavg_forward(x, w, b, *, block_b=262144):
    """Forward pass of FedAvgTestModel.

    x: (B, in_f) f32      (PyTorch layout)
    w: (out_f, in_f) f32  (nn.Linear.weight)
    b: (out_f,) f32       (nn.Linear.bias)
    returns (B, out_f) f32 log-probabilities.
    """
    B, in_f = x.shape
    out_f = w.shape[0]

    # Batch padding granularity: 8 sublanes * 128 lanes.
    TILE = 1024
    assert block_b % TILE == 0, "block_b must be a multiple of 1024"

    b_pad = pl.cdiv(B, TILE) * TILE
    if b_pad > block_b:
        # Large batch: fixed big tile, amortizes per-step overhead.
        tb = block_b
        b_pad = pl.cdiv(b_pad, tb) * tb
    elif b_pad >= 2 * TILE:
        # Mid-sized batch: split into (at least) 2 grid steps so v7x's 2 TCs both work.
        tb = pl.cdiv(b_pad, 2 * TILE) * TILE
        b_pad = 2 * tb
    else:
        # Tiny batch: single 1024-sample tile.
        tb = b_pad

    # Feature-major + fused pad (padded columns are zeros -> finite outputs, sliced off).
    x_fm = jnp.pad(x.T.astype(jnp.float32), ((0, 0), (0, b_pad - B)))
    # Sublane-dense layout: (in_f, 8, b_pad // 8).
    x_fm = x_fm.reshape(in_f, 8, b_pad // 8)

    # Scoped-VMEM limit sized to the actual double-buffered footprint (+ headroom),
    # so larger tiles don't trip the 16/32 MiB defaults on v5e/v6e.
    vmem_bytes = 2 * (in_f + out_f) * 4 * tb
    vmem_limit = int(min(max(vmem_bytes + (8 << 20), 32 << 20), 128 << 20))

    out_fm = pl.pallas_call(
        _fedavg_kernel,
        out_shape=jax.ShapeDtypeStruct((out_f, 8, b_pad // 8), jnp.float32),
        grid_spec=pltpu.PrefetchScalarGridSpec(
            num_scalar_prefetch=0,
            grid=(b_pad // tb,),
            in_specs=[
                pl.BlockSpec((in_f, 8, tb // 8), lambda i: (0, 0, i)),  # x tile, pipelined
                pl.BlockSpec(memory_space=pltpu.MemorySpace.SMEM),      # weight scalars
                pl.BlockSpec(memory_space=pltpu.MemorySpace.SMEM),      # bias scalars
            ],
            out_specs=pl.BlockSpec((out_f, 8, tb // 8), lambda i: (0, 0, i)),
        ),
        compiler_params=pltpu.CompilerParams(
            dimension_semantics=("parallel",),  # split batch grid across v7x's 2 TCs
            vmem_limit_bytes=vmem_limit,
        ),
    )(x_fm, w.astype(jnp.float32), b.astype(jnp.float32))

    # Invert the sublane-dense reshape, drop padded samples, back to (B, out_f).
    return out_fm.reshape(out_f, b_pad)[:, :B].T


def reference_forward(x, w, b):
    y = x @ w.T + b
    y = jnp.maximum(y, 0.0)
    return jax.nn.log_softmax(y, axis=1)


if __name__ == "__main__":
    key = jax.random.PRNGKey(0)
    k_x, k_w, k_b = jax.random.split(key, 3)

    in_features, out_features = 10, 2
    batch = 8

    # Deterministic parameter init (mimics nn.Linear's uniform(-1/sqrt(fan_in), +1/sqrt(fan_in)))
    bound = 1.0 / (in_features ** 0.5)
    w = jax.random.uniform(k_w, (out_features, in_features), jnp.float32, -bound, bound)
    b = jax.random.uniform(k_b, (out_features,), jnp.float32, -bound, bound)
    x = jax.random.normal(k_x, (batch, in_features), jnp.float32)

    out = fedavg_forward(x, w, b)
    out = jax.block_until_ready(out)

    ref = reference_forward(x, w, b)
    assert out.shape == (batch, out_features)
    assert jnp.allclose(out, ref, atol=1e-5, rtol=1e-5)

    print("KERNEL_OK")
</pallas_src>

<mosaic_0001>
module attributes {stable_mosaic.version = 11 : i64} {
  func.func @_fedavg_kernel(%arg0: i32, %arg1: memref<10x8x128xf32, #tpu.memory_space<vmem>>, %arg2: memref<2x10xf32, #tpu.memory_space<smem>>, %arg3: memref<2xf32, #tpu.memory_space<smem>>, %arg4: memref<2x8x128xf32, #tpu.memory_space<vmem>>) attributes {dimension_semantics = [#tpu.dimension_semantics<parallel>], iteration_bounds = array<i64: 1>, scalar_prefetch = 0 : i64, scratch_operands = 0 : i64, tpu.core_type = #tpu.core_type<tc>, window_params = [{transform_indices = @transform_0, window_bounds = array<i64: 10, 8, 128>}, {transform_indices = @transform_1, window_bounds = array<i64: 2, 10>}, {transform_indices = @transform_2, window_bounds = array<i64: 2>}, {transform_indices = @transform_3, window_bounds = array<i64: 2, 8, 128>}]} {
    %c0 = arith.constant 0 : index
    %c0_0 = arith.constant 0 : index
    %c0_1 = arith.constant 0 : index
    %0 = vector.load %arg1[%c0, %c0_0, %c0_1] : memref<10x8x128xf32, #tpu.memory_space<vmem>>, vector<1x8x128xf32>
    %1 = vector.shape_cast %0 : vector<1x8x128xf32> to vector<8x128xf32>
    %c0_2 = arith.constant 0 : index
    %c0_3 = arith.constant 0 : index
    %2 = memref.load %arg2[%c0_2, %c0_3] : memref<2x10xf32, #tpu.memory_space<smem>>
    %3 = vector.broadcast %2 : f32 to vector<8x128xf32>
    %4 = arith.mulf %1, %3 : vector<8x128xf32>
    %c1 = arith.constant 1 : index
    %c0_4 = arith.constant 0 : index
    %5 = memref.load %arg2[%c1, %c0_4] : memref<2x10xf32, #tpu.memory_space<smem>>
    %6 = vector.broadcast %5 : f32 to vector<8x128xf32>
    %7 = arith.mulf %1, %6 : vector<8x128xf32>
    %c1_5 = arith.constant 1 : index
    %c0_6 = arith.constant 0 : index
    %c0_7 = arith.constant 0 : index
    %8 = vector.load %arg1[%c1_5, %c0_6, %c0_7] : memref<10x8x128xf32, #tpu.memory_space<vmem>>, vector<1x8x128xf32>
    %9 = vector.shape_cast %8 : vector<1x8x128xf32> to vector<8x128xf32>
    %c0_8 = arith.constant 0 : index
    %c1_9 = arith.constant 1 : index
    %10 = memref.load %arg2[%c0_8, %c1_9] : memref<2x10xf32, #tpu.memory_space<smem>>
    %11 = vector.broadcast %10 : f32 to vector<8x128xf32>
    %12 = arith.mulf %9, %11 : vector<8x128xf32>
    %13 = arith.addf %4, %12 : vector<8x128xf32>
    %c1_10 = arith.constant 1 : index
    %c1_11 = arith.constant 1 : index
    %14 = memref.load %arg2[%c1_10, %c1_11] : memref<2x10xf32, #tpu.memory_space<smem>>
    %15 = vector.broadcast %14 : f32 to vector<8x128xf32>
    %16 = arith.mulf %9, %15 : vector<8x128xf32>
    %17 = arith.addf %7, %16 : vector<8x128xf32>
    %c2 = arith.constant 2 : index
    %c0_12 = arith.constant 0 : index
    %c0_13 = arith.constant 0 : index
    %18 = vector.load %arg1[%c2, %c0_12, %c0_13] : memref<10x8x128xf32, #tpu.memory_space<vmem>>, vector<1x8x128xf32>
    %19 = vector.shape_cast %18 : vector<1x8x128xf32> to vector<8x128xf32>
    %c0_14 = arith.constant 0 : index
    %c2_15 = arith.constant 2 : index
    %20 = memref.load %arg2[%c0_14, %c2_15] : memref<2x10xf32, #tpu.memory_space<smem>>
    %21 = vector.broadcast %20 : f32 to vector<8x128xf32>
    %22 = arith.mulf %19, %21 : vector<8x128xf32>
    %23 = arith.addf %13, %22 : vector<8x128xf32>
    %c1_16 = arith.constant 1 : index
    %c2_17 = arith.constant 2 : index
    %24 = memref.load %arg2[%c1_16, %c2_17] : memref<2x10xf32, #tpu.memory_space<smem>>
    %25 = vector.broadcast %24 : f32 to vector<8x128xf32>
    %26 = arith.mulf %19, %25 : vector<8x128xf32>
    %27 = arith.addf %17, %26 : vector<8x128xf32>
    %c3 = arith.constant 3 : index
    %c0_18 = arith.constant 0 : index
    %c0_19 = arith.constant 0 : index
    %28 = vector.load %arg1[%c3, %c0_18, %c0_19] : memref<10x8x128xf32, #tpu.memory_space<vmem>>, vector<1x8x128xf32>
    %29 = vector.shape_cast %28 : vector<1x8x128xf32> to vector<8x128xf32>
    %c0_20 = arith.constant 0 : index
    %c3_21 = arith.constant 3 : index
    %30 = memref.load %arg2[%c0_20, %c3_21] : memref<2x10xf32, #tpu.memory_space<smem>>
    %31 = vector.broadcast %30 : f32 to vector<8x128xf32>
    %32 = arith.mulf %29, %31 : vector<8x128xf32>
    %33 = arith.addf %23, %32 : vector<8x128xf32>
    %c1_22 = arith.constant 1 : index
    %c3_23 = arith.constant 3 : index
    %34 = memref.load %arg2[%c1_22, %c3_23] : memref<2x10xf32, #tpu.memory_space<smem>>
    %35 = vector.broadcast %34 : f32 to vector<8x128xf32>
    %36 = arith.mulf %29, %35 : vector<8x128xf32>
    %37 = arith.addf %27, %36 : vector<8x128xf32>
    %c4 = arith.constant 4 : index
    %c0_24 = arith.constant 0 : index
    %c0_25 = arith.constant 0 : index
    %38 = vector.load %arg1[%c4, %c0_24, %c0_25] : memref<10x8x128xf32, #tpu.memory_space<vmem>>, vector<1x8x128xf32>
    %39 = vector.shape_cast %38 : vector<1x8x128xf32> to vector<8x128xf32>
    %c0_26 = arith.constant 0 : index
    %c4_27 = arith.constant 4 : index
    %40 = memref.load %arg2[%c0_26, %c4_27] : memref<2x10xf32, #tpu.memory_space<smem>>
    %41 = vector.broadcast %40 : f32 to vector<8x128xf32>
    %42 = arith.mulf %39, %41 : vector<8x128xf32>
    %43 = arith.addf %33, %42 : vector<8x128xf32>
    %c1_28 = arith.constant 1 : index
    %c4_29 = arith.constant 4 : index
    %44 = memref.load %arg2[%c1_28, %c4_29] : memref<2x10xf32, #tpu.memory_space<smem>>
    %45 = vector.broadcast %44 : f32 to vector<8x128xf32>
    %46 = arith.mulf %39, %45 : vector<8x128xf32>
    %47 = arith.addf %37, %46 : vector<8x128xf32>
    %c5 = arith.constant 5 : index
    %c0_30 = arith.constant 0 : index
    %c0_31 = arith.constant 0 : index
    %48 = vector.load %arg1[%c5, %c0_30, %c0_31] : memref<10x8x128xf32, #tpu.memory_space<vmem>>, vector<1x8x128xf32>
    %49 = vector.shape_cast %48 : vector<1x8x128xf32> to vector<8x128xf32>
    %c0_32 = arith.constant 0 : index
    %c5_33 = arith.constant 5 : index
    %50 = memref.load %arg2[%c0_32, %c5_33] : memref<2x10xf32, #tpu.memory_space<smem>>
    %51 = vector.broadcast %50 : f32 to vector<8x128xf32>
    %52 = arith.mulf %49, %51 : vector<8x128xf32>
    %53 = arith.addf %43, %52 : vector<8x128xf32>
    %c1_34 = arith.constant 1 : index
    %c5_35 = arith.constant 5 : index
    %54 = memref.load %arg2[%c1_34, %c5_35] : memref<2x10xf32, #tpu.memory_space<smem>>
    %55 = vector.broadcast %54 : f32 to vector<8x128xf32>
    %56 = arith.mulf %49, %55 : vector<8x128xf32>
    %57 = arith.addf %47, %56 : vector<8x128xf32>
    %c6 = arith.constant 6 : index
    %c0_36 = arith.constant 0 : index
    %c0_37 = arith.constant 0 : index
    %58 = vector.load %arg1[%c6, %c0_36, %c0_37] : memref<10x8x128xf32, #tpu.memory_space<vmem>>, vector<1x8x128xf32>
    %59 = vector.shape_cast %58 : vector<1x8x128xf32> to vector<8x128xf32>
    %c0_38 = arith.constant 0 : index
    %c6_39 = arith.constant 6 : index
    %60 = memref.load %arg2[%c0_38, %c6_39] : memref<2x10xf32, #tpu.memory_space<smem>>
    %61 = vector.broadcast %60 : f32 to vector<8x128xf32>
    %62 = arith.mulf %59, %61 : vector<8x128xf32>
    %63 = arith.addf %53, %62 : vector<8x128xf32>
    %c1_40 = arith.constant 1 : index
    %c6_41 = arith.constant 6 : index
    %64 = memref.load %arg2[%c1_40, %c6_41] : memref<2x10xf32, #tpu.memory_space<smem>>
    %65 = vector.broadcast %64 : f32 to vector<8x128xf32>
    %66 = arith.mulf %59, %65 : vector<8x128xf32>
    %67 = arith.addf %57, %66 : vector<8x128xf32>
    %c7 = arith.constant 7 : index
    %c0_42 = arith.constant 0 : index
    %c0_43 = arith.constant 0 : index
    %68 = vector.load %arg1[%c7, %c0_42, %c0_43] : memref<10x8x128xf32, #tpu.memory_space<vmem>>, vector<1x8x128xf32>
    %69 = vector.shape_cast %68 : vector<1x8x128xf32> to vector<8x128xf32>
    %c0_44 = arith.constant 0 : index
    %c7_45 = arith.constant 7 : index
    %70 = memref.load %arg2[%c0_44, %c7_45] : memref<2x10xf32, #tpu.memory_space<smem>>
    %71 = vector.broadcast %70 : f32 to vector<8x128xf32>
    %72 = arith.mulf %69, %71 : vector<8x128xf32>
    %73 = arith.addf %63, %72 : vector<8x128xf32>
    %c1_46 = arith.constant 1 : index
    %c7_47 = arith.constant 7 : index
    %74 = memref.load %arg2[%c1_46, %c7_47] : memref<2x10xf32, #tpu.memory_space<smem>>
    %75 = vector.broadcast %74 : f32 to vector<8x128xf32>
    %76 = arith.mulf %69, %75 : vector<8x128xf32>
    %77 = arith.addf %67, %76 : vector<8x128xf32>
    %c8 = arith.constant 8 : index
    %c0_48 = arith.constant 0 : index
    %c0_49 = arith.constant 0 : index
    %78 = vector.load %arg1[%c8, %c0_48, %c0_49] : memref<10x8x128xf32, #tpu.memory_space<vmem>>, vector<1x8x128xf32>
    %79 = vector.shape_cast %78 : vector<1x8x128xf32> to vector<8x128xf32>
    %c0_50 = arith.constant 0 : index
    %c8_51 = arith.constant 8 : index
    %80 = memref.load %arg2[%c0_50, %c8_51] : memref<2x10xf32, #tpu.memory_space<smem>>
    %81 = vector.broadcast %80 : f32 to vector<8x128xf32>
    %82 = arith.mulf %79, %81 : vector<8x128xf32>
    %83 = arith.addf %73, %82 : vector<8x128xf32>
    %c1_52 = arith.constant 1 : index
    %c8_53 = arith.constant 8 : index
    %84 = memref.load %arg2[%c1_52, %c8_53] : memref<2x10xf32, #tpu.memory_space<smem>>
    %85 = vector.broadcast %84 : f32 to vector<8x128xf32>
    %86 = arith.mulf %79, %85 : vector<8x128xf32>
    %87 = arith.addf %77, %86 : vector<8x128xf32>
    %c9 = arith.constant 9 : index
    %c0_54 = arith.constant 0 : index
    %c0_55 = arith.constant 0 : index
    %88 = vector.load %arg1[%c9, %c0_54, %c0_55] : memref<10x8x128xf32, #tpu.memory_space<vmem>>, vector<1x8x128xf32>
    %89 = vector.shape_cast %88 : vector<1x8x128xf32> to vector<8x128xf32>
    %c0_56 = arith.constant 0 : index
    %c9_57 = arith.constant 9 : index
    %90 = memref.load %arg2[%c0_56, %c9_57] : memref<2x10xf32, #tpu.memory_space<smem>>
    %91 = vector.broadcast %90 : f32 to vector<8x128xf32>
    %92 = arith.mulf %89, %91 : vector<8x128xf32>
    %93 = arith.addf %83, %92 : vector<8x128xf32>
    %c1_58 = arith.constant 1 : index
    %c9_59 = arith.constant 9 : index
    %94 = memref.load %arg2[%c1_58, %c9_59] : memref<2x10xf32, #tpu.memory_space<smem>>
    %95 = vector.broadcast %94 : f32 to vector<8x128xf32>
    %96 = arith.mulf %89, %95 : vector<8x128xf32>
    %97 = arith.addf %87, %96 : vector<8x128xf32>
    %c0_60 = arith.constant 0 : index
    %98 = memref.load %arg3[%c0_60] : memref<2xf32, #tpu.memory_space<smem>>
    %99 = vector.broadcast %98 : f32 to vector<8x128xf32>
    %100 = arith.addf %93, %99 : vector<8x128xf32>
    %c1_61 = arith.constant 1 : index
    %101 = memref.load %arg3[%c1_61] : memref<2xf32, #tpu.memory_space<smem>>
    %102 = vector.broadcast %101 : f32 to vector<8x128xf32>
    %103 = arith.addf %97, %102 : vector<8x128xf32>
    %cst = arith.constant 0.000000e+00 : f32
    %104 = vector.broadcast %cst : f32 to vector<8x128xf32>
    %105 = arith.maximumf %100, %104 : vector<8x128xf32>
    %cst_62 = arith.constant 0.000000e+00 : f32
    %106 = vector.broadcast %cst_62 : f32 to vector<8x128xf32>
    %107 = arith.maximumf %103, %106 : vector<8x128xf32>
    %108 = arith.maximumf %105, %107 : vector<8x128xf32>
    %109 = arith.subf %105, %107 : vector<8x128xf32>
    %110 = math.absf %109 : vector<8x128xf32>
    %cst_63 = arith.constant 0.000000e+00 : f32
    %111 = vector.broadcast %cst_63 : f32 to vector<8x128xf32>
    %112 = arith.subf %111, %110 : vector<8x128xf32>
    %113 = math.exp %112 : vector<8x128xf32>
    %114 = math.log1p %113 : vector<8x128xf32>
    %115 = arith.addf %108, %114 : vector<8x128xf32>
    %116 = arith.subf %105, %115 : vector<8x128xf32>
    %c0_64 = arith.constant 0 : index
    %c0_65 = arith.constant 0 : index
    %c0_66 = arith.constant 0 : index
    %117 = vector.load %arg4[%c0_64, %c0_65, %c0_66] : memref<2x8x128xf32, #tpu.memory_space<vmem>>, vector<1x8x128xf32>
    %118 = vector.shape_cast %117 : vector<1x8x128xf32> to vector<8x128xf32>
    %119 = vector.shape_cast %116 : vector<8x128xf32> to vector<1x8x128xf32>
    tpu.vector_store %arg4[%c0_64, %c0_65, %c0_66], %119 {strides = array<i32>} : memref<2x8x128xf32, #tpu.memory_space<vmem>>, vector<1x8x128xf32>,
    %120 = arith.subf %107, %115 : vector<8x128xf32>
    %c1_67 = arith.constant 1 : index
    %c0_68 = arith.constant 0 : index
    %c0_69 = arith.constant 0 : index
    %121 = vector.load %arg4[%c1_67, %c0_68, %c0_69] : memref<2x8x128xf32, #tpu.memory_space<vmem>>, vector<1x8x128xf32>
    %122 = vector.shape_cast %121 : vector<1x8x128xf32> to vector<8x128xf32>
    %123 = vector.shape_cast %120 : vector<8x128xf32> to vector<1x8x128xf32>
    tpu.vector_store %arg4[%c1_67, %c0_68, %c0_69], %123 {strides = array<i32>} : memref<2x8x128xf32, #tpu.memory_space<vmem>>, vector<1x8x128xf32>,
    return
  }
  func.func @transform_0(%arg0: i32) -> (i32, i32, i32) {
    %c0_i32 = arith.constant 0 : i32
    %c0_i32_0 = arith.constant 0 : i32
    %c0_i32_1 = arith.constant 0 : i32
    return %c0_i32, %c0_i32_0, %arg0 : i32, i32, i32
  }
  func.func @transform_1(%arg0: i32) -> (i32, i32) {
    %c0_i32 = arith.constant 0 : i32
    %c0_i32_0 = arith.constant 0 : i32
    %c0_i32_1 = arith.constant 0 : i32
    return %c0_i32, %c0_i32_0 : i32, i32
  }
  func.func @transform_2(%arg0: i32) -> i32 {
    %c0_i32 = arith.constant 0 : i32
    %c0_i32_0 = arith.constant 0 : i32
    return %c0_i32 : i32
  }
  func.func @transform_3(%arg0: i32) -> (i32, i32, i32) {
    %c0_i32 = arith.constant 0 : i32
    %c0_i32_0 = arith.constant 0 : i32
    %c0_i32_1 = arith.constant 0 : i32
    return %c0_i32, %c0_i32_0, %arg0 : i32, i32, i32
  }
}

</mosaic_0001>

<bundles_post_ra>
// kernel: fedavg_forward.1
= control target key start
LH: loop header
LB: loop body
LE: loop exit
PB: predicated region body
PF: predicated region fallthrough
CT: control target
= control target key end

     0   :  { %8 = vsyncpa [#allocation3], 0  ;;  %s299_s0 = inlined_call_operand.vmem [shape: f32[10,8,128], index: 0, kind: input, shape index: {}]   ;;  %s300_s1 = inlined_call_operand.vmem [shape: f32[2,10], index: 1, kind: input, shape index: {}]   ;;  %s301_s2 = inlined_call_operand.vmem [shape: f32[2], index: 2, kind: input, shape index: {}]   ;;  %s302_s3 = inlined_call_operand.vmem [shape: f32[2,8,128], index: 3, kind: output, shape index: {}]  }
   0x1   :  { %s17_s14 = sshll.u32 %s300_s1, 4  ;;  %s18_s14 = int_to_ptr.vmem [resolvable:$true] %s17_s14 }
   0x2   :  { %9 = vsyncpa [#allocation5], 0  ;;  %s26_s17 = sshll.u32 %s301_s2, 4  ;;  %s235_s18 = smov [#allocation2]   ;;  %s27_s17 = int_to_ptr.vmem [resolvable:$true] %s26_s17 }
   0x3   :  { %20 = dma.vmem_to_smem %s18_s14, 32, %s235_s18, [#allocation3]  }
   0x4   :  { %s236_s19 = smov [#allocation4]  }
   0x5   :  { %29 = dma.vmem_to_smem %s27_s17, 16, %s236_s19, [#allocation5]  }
   0x6   :  { %231 = dma.done.wait [#allocation3], 32  }
   0x7   :  { %232 = vsyncadd [#allocation3], 4294967264 }
   0x8   :  { %233 = dma.done.wait [#allocation5], 16  }
   0x9   :  { %234 = vsyncadd [#allocation5], 4294967280 }
   0xa   :  { %38 = sfence }
   0xb   :  { %s40_s20 = sld [smem:[#allocation2]]  ;;  %v39_v0 = vld [vmem:[%s299_s0] sm:$0xff]  ;;  %v172_v2 = vld [vmem:[%s299_s0 + $0x8] sm:$0xff]  ;;  %v175_v7 = vld [vmem:[%s299_s0 + $0x10] sm:$0xff] }
   0xc   :  { %s171_s21 = sld [smem:[#allocation2 + $0x80]]  ;;  %v178_v12 = vld [vmem:[%s299_s0 + $0x18] sm:$0xff]  ;;  %v181_v19 = vld [vmem:[%s299_s0 + $0x20] sm:$0xff]  ;;  %v184_v26 = vld [vmem:[%s299_s0 + $0x28] sm:$0xff] }
   0xd   :  { %s173_s22 = sld [smem:[#allocation2 + $0x1]]  ;;  %v187_v33 = vld [vmem:[%s299_s0 + $0x30] sm:$0xff]  ;;  %v190_v40 = vld [vmem:[%s299_s0 + $0x38] sm:$0xff]  ;;  %v193_v47 = vld [vmem:[%s299_s0 + $0x40] sm:$0xff] }
   0xe   :  { %s174_s1 = sld [smem:[#allocation2 + $0x81]]  ;;  %v196_v54 = vld [vmem:[%s299_s0 + $0x48] sm:$0xff] }
   0xf   :  { %s176_s25 = sld [smem:[#allocation2 + $0x2]] }
  0x10   :  { %s177_s2 = sld [smem:[#allocation2 + $0x82]] }
  0x11   :  { %v41_v1 = vstv %s40_s20  ;;  %s179_s28 = sld [smem:[#allocation2 + $0x3]] }
  0x12   :  { %v42_v3 = vmul.f32 %v41_v1, %v39_v0  ;;  %v44_v4 = vstv %s171_s21  ;;  %s180_s29 = sld [smem:[#allocation2 + $0x83]] }
  0x13   :  { %v45_v5 = vmul.f32 %v44_v4, %v39_v0  ;;  %v49_v6 = vstv %s173_s22  ;;  %s182_s5 = sld [smem:[#allocation2 + $0x4]] }
  0x14   :  { %v50_v8 = vmul.f32 %v172_v2, %v49_v6  ;;  %v53_v9 = vstv %s174_s1  ;;  %s183_s6 = sld [smem:[#allocation2 + $0x84]] }
  0x15   :  { %v54_v10 = vmul.f32 %v172_v2, %v53_v9  ;;  %v59_v11 = vstv %s176_s25  ;;  %s185_s9 = sld [smem:[#allocation2 + $0x5]] }
  0x16   :  { %v51_v13 = vadd.f32 %v50_v8, %v42_v3  ;;  %v60_v14 = vmul.f32 %v175_v7, %v59_v11  ;;  %v63_v15 = vstv %s177_s2  ;;  %s186_s10 = sld [smem:[#allocation2 + $0x85]] }
  0x17   :  { %v55_v16 = vadd.f32 %v54_v10, %v45_v5  ;;  %v64_v17 = vmul.f32 %v175_v7, %v63_v15  ;;  %v69_v18 = vstv %s179_s28  ;;  %s188_s13 = sld [smem:[#allocation2 + $0x6]] }
  0x18   :  { %v61_v20 = vadd.f32 %v60_v14, %v51_v13  ;;  %v70_v21 = vmul.f32 %v178_v12, %v69_v18  ;;  %v73_v22 = vstv %s180_s29  ;;  %s189_s14 = sld [smem:[#allocation2 + $0x86]] }
  0x19   :  { %v65_v23 = vadd.f32 %v64_v17, %v55_v16  ;;  %v74_v24 = vmul.f32 %v178_v12, %v73_v22  ;;  %v79_v25 = vstv %s182_s5  ;;  %s191_s17 = sld [smem:[#allocation2 + $0x7]] }
  0x1a   :  { %v71_v27 = vadd.f32 %v70_v21, %v61_v20  ;;  %v80_v28 = vmul.f32 %v181_v19, %v79_v25  ;;  %v83_v29 = vstv %s183_s6  ;;  %s192_s18 = sld [smem:[#allocation2 + $0x87]] }
  0x1b   :  { %v75_v30 = vadd.f32 %v74_v24, %v65_v23  ;;  %v84_v31 = vmul.f32 %v181_v19, %v83_v29  ;;  %v89_v32 = vstv %s185_s9  ;;  %s194_s21 = sld [smem:[#allocation2 + $0x8]] }
  0x1c   :  { %v81_v34 = vadd.f32 %v80_v28, %v71_v27  ;;  %v90_v35 = vmul.f32 %v184_v26, %v89_v32  ;;  %v93_v36 = vstv %s186_s10  ;;  %s195_s22 = sld [smem:[#allocation2 + $0x88]] }
  0x1d   :  { %v85_v37 = vadd.f32 %v84_v31, %v75_v30  ;;  %v94_v38 = vmul.f32 %v184_v26, %v93_v36  ;;  %v99_v39 = vstv %s188_s13  ;;  %s197_s24 = sld [smem:[#allocation2 + $0x9]] }
  0x1e   :  { %v91_v41 = vadd.f32 %v90_v35, %v81_v34  ;;  %v100_v42 = vmul.f32 %v187_v33, %v99_v39  ;;  %v103_v43 = vstv %s189_s14  ;;  %s198_s25 = sld [smem:[#allocation2 + $0x89]] }
  0x1f   :  { %v95_v44 = vadd.f32 %v94_v38, %v85_v37  ;;  %v104_v45 = vmul.f32 %v187_v33, %v103_v43  ;;  %v109_v46 = vstv %s191_s17  ;;  %s136_s27 = sld [smem:[#allocation4]] }
  0x20   :  { %v101_v48 = vadd.f32 %v100_v42, %v91_v41  ;;  %v110_v49 = vmul.f32 %v190_v40, %v109_v46  ;;  %v113_v50 = vstv %s192_s18  ;;  %s199_s28 = sld [smem:[#allocation4 + $0x1]] }
  0x21   :  { %v105_v51 = vadd.f32 %v104_v45, %v95_v44  ;;  %v114_v52 = vmul.f32 %v190_v40, %v113_v50  ;;  %v119_v53 = vstv %s194_s21 }
  0x22   :  { %v111_v55 = vadd.f32 %v110_v49, %v101_v48  ;;  %v120_v56 = vmul.f32 %v193_v47, %v119_v53  ;;  %v123_v57 = vstv %s195_s22 }
  0x23   :  { %v115_v58 = vadd.f32 %v114_v52, %v105_v51  ;;  %v124_v59 = vmul.f32 %v193_v47, %v123_v57  ;;  %v129_v60 = vstv %s197_s24 }
  0x24   :  { %v121_v61 = vadd.f32 %v120_v56, %v111_v55  ;;  %v130_v62 = vmul.f32 %v196_v54, %v129_v60  ;;  %v133_v63 = vstv %s198_s25 }
  0x25   :  { %v125_v0 = vadd.f32 %v124_v59, %v115_v58  ;;  %v134_v1 = vmul.f32 %v196_v54, %v133_v63  ;;  %v137_v2 = vstv %s136_s27 }
  0x26   :  { %v131_v3 = vadd.f32 %v130_v62, %v121_v61  ;;  %v140_v4 = vstv %s199_s28 }
  0x27   :  { %v135_v5 = vadd.f32 %v134_v1, %v125_v0 }
  0x28   :  { %v138_v6 = vadd.f32 %v137_v2, %v131_v3 }
  0x29   :  { %v141_v7 = vadd.f32 %v140_v4, %v135_v5 }
  0x2a   :  { %v142_v8 = vmax.f32 %v138_v6, 0.0 }
  0x2b   :  { %v143_v9 = vmax.f32 %v141_v7, 0.0 }
  0x2d   :  { %v145_v10 = vsub.f32 %v142_v8, %v143_v9  ;;  %v144_v21 = vmax.f32 %v142_v8, %v143_v9 }
  0x2f   :  { %v146_v11 = vand.u32 2147483647, %v145_v10 }
  0x31   :  { %v147_v12 = vsub.f32 0.0, %v146_v11 }
  0x33   :  { %v148_v13 = vmul.f32 1.442695, %v147_v12 }
  0x35   :  { %203 = vpow2.f32 %v148_v13 }
  0x3b   :  { %v204_v14 = vpop.eup %203 }
  0x3c   :  { %v150_v15 = vadd.f32 1.0, %v204_v14  ;;  %v153_v16 = vmul.f32 -0.5, %v204_v14  ;;  %v156_v18 = vand.u32 2147483647, %v204_v14 }
  0x3e   :  { %205 = vlog2.f32 %v150_v15  ;;  %v154_v17 = vadd.f32 1.0, %v153_v16  ;;  %vm157_vm0 = vcmp.lt.f32.partialorder %v156_v18, 0.0004427343 }
  0x40   :  { %v155_v19 = vmul.f32 %v204_v14, %v154_v17 }
  0x44   :  { %v206_v20 = vpop.eup %205 }
  0x45   :  { %v152_v22 = vmul.f32 0.6931472, %v206_v20 }
  0x47   :  { %v158_v23 = vsel %vm157_vm0, %v155_v19, %v152_v22 }
  0x48   :  { %v159_v24 = vadd.f32 %v158_v23, %v144_v21 }
  0x4a   :  { %v160_v25 = vsub.f32 %v142_v8, %v159_v24  ;;  %v162_v26 = vsub.f32 %v143_v9, %v159_v24 }
  0x4c   :  { %161 = vst [vmem:[%s302_s3] sm:$0xff] %v160_v25 }
  0x4d   :  { %200 = vst [vmem:[%s302_s3 + $0x8] sm:$0xff] %v162_v26 }
  0x4e   :  { %169 = vsyncpa [#allocation3], 1 }
  0x4f   :  { %170 = vsyncpa [#allocation5], 1 }

</bundles_post_ra>
